<compile_context>
chip_gen: v7x
topology: tpu7x:2x2x1
jax: 0.10.0
libtpu: 0.0.40
codegen_flags: <defaults>
</compile_context>

<pallas_src>
import jax
import jax.numpy as jnp
from jax.experimental import pallas as pl
from jax.experimental.pallas import tpu as pltpu  # noqa: F401  (TPU backend)

# --- model dimensions (small, consistent with an LM forward) ----------------
B = 2        # batch
S = 8        # sequence length
H = 32       # hidden size
F = 64       # MLP (ffn) size
V = 128      # vocab size

# --- packed weight slab layout: [R_TOTAL, 128] f32, row offsets all %8 == 0 -
LANES = 128
R_WTE, N_WTE = 0, V                    # [V, H]   token embedding
R_WPE, N_WPE = R_WTE + N_WTE, 8        # [S, H]   positional embedding
R_LN, N_LN = R_WPE + N_WPE, 8          # rows 0/1 = gamma/beta     [1, H] each
R_W1, N_W1 = R_LN + N_LN, H            # [H, F]   MLP in
R_B1, N_B1 = R_W1 + N_W1, 8            # [1, F]
R_W2, N_W2 = R_B1 + N_B1, F            # [F, H]   MLP out
R_B2, N_B2 = R_W2 + N_W2, 8            # [1, H]
R_WLM, N_WLM = R_B2 + N_B2, H          # [H, V]   LM head
R_BLM, N_BLM = R_WLM + N_WLM, 8        # [1, V]
R_TOTAL = R_BLM + N_BLM                # 296 rows (~148 KiB)


# -----------------------------------------------------------------------------
# Single fused kernel:
#   x      = onehot(tok) @ wte + onehot(pos) @ wpe       (embedding + pos)
#   xn     = LayerNorm(x) * gamma + beta
#   y      = gelu(xn @ W1 + b1) @ W2 + b2
#   logits = (x + y) @ W_lm + b_lm
# All operands are single full-array VMEM blocks (two input DMAs total).
# -----------------------------------------------------------------------------
def chatbot_kernel(ids_ref, w_ref, o_ref):
    T = ids_ref.shape[0]

    # ---- token embedding: exactly 128-lane one-hot -> one MXU pass ----------
    ids = ids_ref[...]                                              # [T, 1] i32
    col_v = jax.lax.broadcasted_iota(jnp.int32, (T, V), 1)
    tok_onehot = (col_v == ids).astype(jnp.float32)                 # [T, V]
    wte = w_ref[R_WTE:R_WTE + V, 0:H]                               # [V, H]
    x = jnp.dot(tok_onehot, wte, preferred_element_type=jnp.float32)  # [T, H]

    # ---- positional embedding: positions are a static function of the row ---
    row_s = jax.lax.broadcasted_iota(jnp.int32, (T, S), 0)
    col_s = jax.lax.broadcasted_iota(jnp.int32, (T, S), 1)
    pos_onehot = ((row_s % S) == col_s).astype(jnp.float32)         # [T, S]
    wpe = w_ref[R_WPE:R_WPE + S, 0:H]                               # [S, H]
    x = x + jnp.dot(pos_onehot, wpe, preferred_element_type=jnp.float32)

    # ---- LayerNorm over the hidden (lane) axis -------------------------------
    ln = w_ref[R_LN:R_LN + 2, 0:H]                                  # [2, H]
    gamma = ln[0:1, :]
    beta = ln[1:2, :]
    mu = jnp.mean(x, axis=-1, keepdims=True)
    var = jnp.mean((x - mu) ** 2, axis=-1, keepdims=True)
    xn = (x - mu) * jax.lax.rsqrt(var + 1e-5)
    xn = xn * gamma + beta

    # ---- MLP (GELU) + residual -----------------------------------------------
    w1 = w_ref[R_W1:R_W1 + H, 0:F]                                  # [H, F]
    b1 = w_ref[R_B1:R_B1 + 1, 0:F]                                  # [1, F]
    h = jax.nn.gelu(jnp.dot(xn, w1, preferred_element_type=jnp.float32) + b1)
    w2 = w_ref[R_W2:R_W2 + F, 0:H]                                  # [F, H]
    b2 = w_ref[R_B2:R_B2 + 1, 0:H]                                  # [1, H]
    y = jnp.dot(h, w2, preferred_element_type=jnp.float32) + b2
    x = x + y                                                       # residual

    # ---- LM head (lane-dense [T, V=128] output) ------------------------------
    w_lm = w_ref[R_WLM:R_WLM + H, 0:V]                              # [H, V]
    b_lm = w_ref[R_BLM:R_BLM + 1, 0:V]                              # [1, V]
    logits = jnp.dot(x, w_lm, preferred_element_type=jnp.float32) + b_lm
    o_ref[...] = logits.astype(o_ref.dtype)


def _full_spec(shape):
    # full-array block, single (implicit) grid point
    return pl.BlockSpec(shape, lambda: tuple(0 for _ in shape))


# -----------------------------------------------------------------------------
# Parameters: one pre-packed, lane-padded weight slab (single HBM input).
# -----------------------------------------------------------------------------
def init_params(key):
    ks = jax.random.split(key, 5)
    wte = jax.random.normal(ks[0], (V, H), jnp.float32) * 0.02
    wpe = jax.random.normal(ks[1], (S, H), jnp.float32) * 0.02
    gamma = jnp.ones((1, H), jnp.float32)
    beta = jnp.zeros((1, H), jnp.float32)
    w1 = jax.random.normal(ks[2], (H, F), jnp.float32) * 0.02
    b1 = jnp.zeros((1, F), jnp.float32)
    w2 = jax.random.normal(ks[3], (F, H), jnp.float32) * 0.02
    b2 = jnp.zeros((1, H), jnp.float32)
    w_lm = jax.random.normal(ks[4], (H, V), jnp.float32) * 0.02
    b_lm = jnp.zeros((1, V), jnp.float32)

    def blk(a, rows):
        r, c = a.shape
        return jnp.pad(a, ((0, rows - r), (0, LANES - c)))

    slab = jnp.concatenate(
        [
            blk(wte, N_WTE),
            blk(wpe, N_WPE),
            blk(jnp.concatenate([gamma, beta], axis=0), N_LN),
            blk(w1, N_W1),
            blk(b1, N_B1),
            blk(w2, N_W2),
            blk(b2, N_B2),
            blk(w_lm, N_WLM),
            blk(b_lm, N_BLM),
        ],
        axis=0,
    )
    assert slab.shape == (R_TOTAL, LANES), slab.shape
    return {"slab": slab}


# -----------------------------------------------------------------------------
# Chatbot.forward(input_ids) -> logits  [B, S, V]
# -----------------------------------------------------------------------------
@jax.jit
def chatbot_forward(params, input_ids):
    b, s = input_ids.shape
    t = b * s
    tok_ids = input_ids.reshape(t, 1).astype(jnp.int32)   # [T, 1]

    logits = pl.pallas_call(
        chatbot_kernel,
        out_shape=jax.ShapeDtypeStruct((t, V), jnp.float32),
        in_specs=[_full_spec((t, 1)),
                  _full_spec((R_TOTAL, LANES))],
        out_specs=_full_spec((t, V)),
    )(tok_ids, params["slab"])
    return logits.reshape(b, s, V)


# -----------------------------------------------------------------------------
# Pure-JAX reference (same math, unpacked from the slab) for correctness.
# -----------------------------------------------------------------------------
def reference_forward(params, input_ids):
    slab = params["slab"]
    wte = slab[R_WTE:R_WTE + V, :H]
    wpe = slab[R_WPE:R_WPE + S, :H]
    gamma = slab[R_LN:R_LN + 1, :H]
    beta = slab[R_LN + 1:R_LN + 2, :H]
    w1 = slab[R_W1:R_W1 + H, :F]
    b1 = slab[R_B1:R_B1 + 1, :F]
    w2 = slab[R_W2:R_W2 + F, :H]
    b2 = slab[R_B2:R_B2 + 1, :H]
    w_lm = slab[R_WLM:R_WLM + H, :V]
    b_lm = slab[R_BLM:R_BLM + 1, :V]

    b, s = input_ids.shape
    x = (wte[input_ids] + wpe[jnp.arange(s)][None, :, :]).reshape(b * s, H)
    mu = jnp.mean(x, axis=-1, keepdims=True)
    var = jnp.mean((x - mu) ** 2, axis=-1, keepdims=True)
    xn = (x - mu) * jax.lax.rsqrt(var + 1e-5) * gamma + beta
    h = jax.nn.gelu(xn @ w1 + b1)
    y = h @ w2 + b2
    logits = (x + y) @ w_lm + b_lm
    return logits.reshape(b, s, V)


if __name__ == "__main__":
    key = jax.random.PRNGKey(0)
    pkey, dkey = jax.random.split(key)
    params = init_params(pkey)
    input_ids = jax.random.randint(dkey, (B, S), 0, V, dtype=jnp.int32)

    logits = chatbot_forward(params, input_ids)
    jax.block_until_ready(logits)

    assert logits.shape == (B, S, V), logits.shape
    assert logits.dtype == jnp.float32
    assert bool(jnp.all(jnp.isfinite(logits)))

    ref = reference_forward(params, input_ids)
    assert bool(jnp.allclose(logits, ref, atol=1e-3, rtol=1e-2)), (
        float(jnp.max(jnp.abs(logits - ref))))

    print("KERNEL_OK")
</pallas_src>

<mosaic_0001>
module attributes {stable_mosaic.version = 11 : i64} {
  func.func @chatbot_kernel(%arg0: memref<16x1xi32, #tpu.memory_space<vmem>>, %arg1: memref<296x128xf32, #tpu.memory_space<vmem>>, %arg2: memref<16x128xf32, #tpu.memory_space<vmem>>) attributes {dimension_semantics = [], scalar_prefetch = 0 : i64, scratch_operands = 0 : i64, tpu.core_type = #tpu.core_type<tc>} {
    %c0 = arith.constant 0 : index
    %c0_0 = arith.constant 0 : index
    %0 = vector.load %arg0[%c0, %c0_0] : memref<16x1xi32, #tpu.memory_space<vmem>>, vector<16x1xi32>
    %1 = tpu.iota {dimensions = array<i32: 1>} : vector<16x128xi32>
    %2 = vector.broadcast %0 : vector<16x1xi32> to vector<16x128xi32>
    %3 = arith.cmpi eq, %1, %2 : vector<16x128xi32>
    %4 = arith.extui %3 : vector<16x128xi1> to vector<16x128xi32>
    %5 = arith.sitofp %4 : vector<16x128xi32> to vector<16x128xf32>
    %c0_1 = arith.constant 0 : index
    %c0_2 = arith.constant 0 : index
    %6 = vector.load %arg1[%c0_1, %c0_2] : memref<296x128xf32, #tpu.memory_space<vmem>>, vector<128x32xf32>
    %cst = arith.constant dense<0.000000e+00> : vector<16x32xf32>
    %7 = tpu.matmul %5, %6, %cst {dimension_numbers = #tpu.dot_dimension_numbers<[1], [0], [0], [1], [0, 0, 1, 1], [], []>} : vector<16x128xf32>, vector<128x32xf32>, vector<16x32xf32> -> vector<16x32xf32>
    %8 = tpu.iota {dimensions = array<i32: 0>} : vector<16x8xi32>
    %9 = tpu.iota {dimensions = array<i32: 1>} : vector<16x8xi32>
    %c8_i32 = arith.constant 8 : i32
    %c0_i32 = arith.constant 0 : i32
    %10 = arith.cmpi eq, %c8_i32, %c0_i32 : i32
    %c1_i32 = arith.constant 1 : i32
    %11 = arith.select %10, %c1_i32, %c8_i32 : i32
    %12 = vector.broadcast %11 : i32 to vector<16x8xi32>
    %13 = arith.remsi %8, %12 : vector<16x8xi32>
    %c0_i32_3 = arith.constant 0 : i32
    %14 = vector.broadcast %c0_i32_3 : i32 to vector<16x8xi32>
    %15 = arith.cmpi ne, %13, %14 : vector<16x8xi32>
    %c0_i32_4 = arith.constant 0 : i32
    %16 = vector.broadcast %c0_i32_4 : i32 to vector<16x8xi32>
    %17 = arith.cmpi slt, %13, %16 : vector<16x8xi32>
    %c0_i32_5 = arith.constant 0 : i32
    %18 = arith.cmpi slt, %11, %c0_i32_5 : i32
    %19 = vector.broadcast %18 : i1 to vector<16x8xi1>
    %20 = vector.broadcast %19 : vector<16x8xi1> to vector<16x8xi1>
    %21 = arith.xori %17, %20 : vector<16x8xi1>
    %22 = arith.andi %21, %15 : vector<16x8xi1>
    %23 = vector.broadcast %11 : i32 to vector<16x8xi32>
    %24 = arith.addi %13, %23 : vector<16x8xi32>
    %25 = arith.select %22, %24, %13 : vector<16x8xi1>, vector<16x8xi32>
    %26 = arith.cmpi eq, %25, %9 : vector<16x8xi32>
    %27 = arith.extui %26 : vector<16x8xi1> to vector<16x8xi32>
    %28 = arith.sitofp %27 : vector<16x8xi32> to vector<16x8xf32>
    %c128 = arith.constant 128 : index
    %c0_6 = arith.constant 0 : index
    %29 = vector.load %arg1[%c128, %c0_6] : memref<296x128xf32, #tpu.memory_space<vmem>>, vector<8x32xf32>
    %cst_7 = arith.constant dense<0.000000e+00> : vector<16x32xf32>
    %30 = tpu.matmul %28, %29, %cst_7 {dimension_numbers = #tpu.dot_dimension_numbers<[1], [0], [0], [1], [0, 0, 1, 1], [], []>} : vector<16x8xf32>, vector<8x32xf32>, vector<16x32xf32> -> vector<16x32xf32>
    %31 = arith.addf %7, %30 : vector<16x32xf32>
    %c136 = arith.constant 136 : index
    %c0_8 = arith.constant 0 : index
    %32 = vector.load %arg1[%c136, %c0_8] : memref<296x128xf32, #tpu.memory_space<vmem>>, vector<2x32xf32>
    %33 = vector.extract_strided_slice %32 {offsets = [0, 0], sizes = [1, 32], strides = [1, 1]} : vector<2x32xf32> to vector<1x32xf32>
    %34 = vector.extract_strided_slice %32 {offsets = [1, 0], sizes = [1, 32], strides = [1, 1]} : vector<2x32xf32> to vector<1x32xf32>
    %cst_9 = arith.constant dense<0.000000e+00> : vector<16xf32>
    %35 = vector.multi_reduction <add>, %31, %cst_9 [1] : vector<16x32xf32> to vector<16xf32>
    %36 = vector.shape_cast %35 : vector<16xf32> to vector<16x1xf32>
    %cst_10 = arith.constant 3.200000e+01 : f32
    %37 = vector.broadcast %cst_10 : f32 to vector<16x1xf32>
    %38 = arith.divf %36, %37 : vector<16x1xf32>
    %39 = vector.broadcast %38 : vector<16x1xf32> to vector<16x32xf32>
    %40 = arith.subf %31, %39 : vector<16x32xf32>
    %41 = arith.mulf %40, %40 : vector<16x32xf32>
    %cst_11 = arith.constant dense<0.000000e+00> : vector<16xf32>
    %42 = vector.multi_reduction <add>, %41, %cst_11 [1] : vector<16x32xf32> to vector<16xf32>
    %43 = vector.shape_cast %42 : vector<16xf32> to vector<16x1xf32>
    %cst_12 = arith.constant 3.200000e+01 : f32
    %44 = vector.broadcast %cst_12 : f32 to vector<16x1xf32>
    %45 = arith.divf %43, %44 : vector<16x1xf32>
    %46 = vector.broadcast %38 : vector<16x1xf32> to vector<16x32xf32>
    %47 = arith.subf %31, %46 : vector<16x32xf32>
    %cst_13 = arith.constant 9.99999974E-6 : f32
    %48 = vector.broadcast %cst_13 : f32 to vector<16x1xf32>
    %49 = arith.addf %45, %48 : vector<16x1xf32>
    %50 = math.rsqrt %49 : vector<16x1xf32>
    %51 = vector.broadcast %50 : vector<16x1xf32> to vector<16x32xf32>
    %52 = arith.mulf %47, %51 : vector<16x32xf32>
    %53 = vector.broadcast %33 : vector<1x32xf32> to vector<16x32xf32>
    %54 = arith.mulf %52, %53 : vector<16x32xf32>
    %55 = vector.broadcast %34 : vector<1x32xf32> to vector<16x32xf32>
    %56 = arith.addf %54, %55 : vector<16x32xf32>
    %c144 = arith.constant 144 : index
    %c0_14 = arith.constant 0 : index
    %57 = vector.load %arg1[%c144, %c0_14] : memref<296x128xf32, #tpu.memory_space<vmem>>, vector<32x64xf32>
    %c176 = arith.constant 176 : index
    %c0_15 = arith.constant 0 : index
    %58 = vector.load %arg1[%c176, %c0_15] : memref<296x128xf32, #tpu.memory_space<vmem>>, vector<1x64xf32>
    %cst_16 = arith.constant dense<0.000000e+00> : vector<16x64xf32>
    %59 = tpu.matmul %56, %57, %cst_16 {dimension_numbers = #tpu.dot_dimension_numbers<[1], [0], [0], [1], [0, 0, 1, 1], [], []>} : vector<16x32xf32>, vector<32x64xf32>, vector<16x64xf32> -> vector<16x64xf32>
    %60 = vector.broadcast %58 : vector<1x64xf32> to vector<16x64xf32>
    %61 = arith.addf %59, %60 : vector<16x64xf32>
    %62 = arith.mulf %61, %61 : vector<16x64xf32>
    %63 = arith.mulf %61, %62 : vector<16x64xf32>
    %cst_17 = arith.constant 4.471500e-02 : f32
    %64 = vector.broadcast %cst_17 : f32 to vector<16x64xf32>
    %65 = arith.mulf %64, %63 : vector<16x64xf32>
    %66 = arith.addf %61, %65 : vector<16x64xf32>
    %cst_18 = arith.constant 0.797884583 : f32
    %67 = vector.broadcast %cst_18 : f32 to vector<16x64xf32>
    %68 = arith.mulf %67, %66 : vector<16x64xf32>
    %69 = math.tanh %68 : vector<16x64xf32>
    %cst_19 = arith.constant 1.000000e+00 : f32
    %70 = vector.broadcast %cst_19 : f32 to vector<16x64xf32>
    %71 = arith.addf %70, %69 : vector<16x64xf32>
    %cst_20 = arith.constant 5.000000e-01 : f32
    %72 = vector.broadcast %cst_20 : f32 to vector<16x64xf32>
    %73 = arith.mulf %72, %71 : vector<16x64xf32>
    %74 = arith.mulf %61, %73 : vector<16x64xf32>
    %c184 = arith.constant 184 : index
    %c0_21 = arith.constant 0 : index
    %75 = vector.load %arg1[%c184, %c0_21] : memref<296x128xf32, #tpu.memory_space<vmem>>, vector<64x32xf32>
    %c248 = arith.constant 248 : index
    %c0_22 = arith.constant 0 : index
    %76 = vector.load %arg1[%c248, %c0_22] : memref<296x128xf32, #tpu.memory_space<vmem>>, vector<1x32xf32>
    %cst_23 = arith.constant dense<0.000000e+00> : vector<16x32xf32>
    %77 = tpu.matmul %74, %75, %cst_23 {dimension_numbers = #tpu.dot_dimension_numbers<[1], [0], [0], [1], [0, 0, 1, 1], [], []>} : vector<16x64xf32>, vector<64x32xf32>, vector<16x32xf32> -> vector<16x32xf32>
    %78 = vector.broadcast %76 : vector<1x32xf32> to vector<16x32xf32>
    %79 = arith.addf %77, %78 : vector<16x32xf32>
    %80 = arith.addf %31, %79 : vector<16x32xf32>
    %c256 = arith.constant 256 : index
    %c0_24 = arith.constant 0 : index
    %81 = vector.load %arg1[%c256, %c0_24] : memref<296x128xf32, #tpu.memory_space<vmem>>, vector<32x128xf32>
    %c288 = arith.constant 288 : index
    %c0_25 = arith.constant 0 : index
    %82 = vector.load %arg1[%c288, %c0_25] : memref<296x128xf32, #tpu.memory_space<vmem>>, vector<1x128xf32>
    %cst_26 = arith.constant dense<0.000000e+00> : vector<16x128xf32>
    %83 = tpu.matmul %80, %81, %cst_26 {dimension_numbers = #tpu.dot_dimension_numbers<[1], [0], [0], [1], [0, 0, 1, 1], [], []>} : vector<16x32xf32>, vector<32x128xf32>, vector<16x128xf32> -> vector<16x128xf32>
    %84 = vector.broadcast %82 : vector<1x128xf32> to vector<16x128xf32>
    %85 = arith.addf %83, %84 : vector<16x128xf32>
    %c0_27 = arith.constant 0 : index
    %c0_28 = arith.constant 0 : index
    %86 = vector.load %arg2[%c0_27, %c0_28] : memref<16x128xf32, #tpu.memory_space<vmem>>, vector<16x128xf32>
    tpu.vector_store %arg2[%c0_27, %c0_28], %85 {strides = array<i32>} : memref<16x128xf32, #tpu.memory_space<vmem>>, vector<16x128xf32>,
    return
  }
}

</mosaic_0001>

<bundles_post_ra>
// kernel: chatbot_forward.1
= control target key start
LH: loop header
LB: loop body
LE: loop exit
PB: predicated region body
PF: predicated region fallthrough
CT: control target
= control target key end

     0   :  { %7 = vsyncpa [#allocation3], 0  ;;  %s965_s0 = inlined_call_operand.vmem [shape: s32[16,1], index: 0, kind: input, shape index: {}]   ;;  %s966_s1 = inlined_call_operand.hbm [shape: f32[296,128], index: 1, kind: input, shape index: {}]   ;;  %s967_s2 = inlined_call_operand.hbm [shape: f32[16,128], index: 2, kind: output, shape index: {}]  }
   0x1   :  { %8 = vsyncpa [#allocation4], 0  ;;  %s875_s9 = smov [#allocation2]   ;;  %s827_s13 = scalar_lea.hbm %s966_s1, 4736 }
   0x2   :  { %s16_s10 = sshll.u32 %s875_s9, 4  ;;  %p828_p0 = scmp.ne.s32.totalorder %s966_s1, %s827_s13  ;;  %s17_s10 = int_to_ptr.vmem [resolvable:$true] %s16_s10 }
   0x3   :  { %p831_p1 = scmp.lt.u32.totalorder %s827_s13, %s966_s1 }
   0x5   :  { %p833_p2 = pnand %p831_p1, %p828_p0 }
   0x7   :  { %836 = shalt.err (!%p833_p2)
}
   0x8   :  { %s837_s18 = scalar_lea.vmem %s17_s10, 4736  ;;  %p842_p4 = scmp.lt.s32.totalorder %s17_s10, %s17_s10 }
   0x9   :  { %p838_p3 = scmp.ne.s32.totalorder %s17_s10, %s837_s18  ;;  %p843_p5 = scmp.lt.s32.totalorder %s837_s18, %s837_s18 }
   0xb   :  { %p844_p6 = por %p843_p5, %p842_p4 }
   0xd   :  { %p845_p7 = pnand %p844_p6, %p838_p3 }
   0xf   :  { %848 = shalt.err (!%p845_p7)
}
  0x10   :  { %s876_s19 = smov 128   ;;  %s877_s20 = smov 8  }
  0x11   :  { %22 = dma.hbm_to_vmem [thread:$0]  %s966_s1, 4736, %s17_s10, [#allocation3], %s876_s19, %s876_s19, %s877_s20  }
  0x12   :  { %871 = dma.done.wait [#allocation3], 4736  }
  0x13   :  { %872 = vsyncadd [#allocation3], 4294962560  ;;  %v28_v0 = vlaneseq  ;;  %v878_v1 = vmov 0   ;;  %vm92_vm1 = vcmask 64512   ;;  %v26_v7 = vld [vmem:[%s965_s0] sm:$0xff]  ;;  %v879_v9 = vmov 0.0  }
  0x14   :  { %818 = vset.pattern.permute.xlu0 %v878_v1  ;;  %v91_v8 = vld [vmem:[#allocation2 + $0x80] sm:$0xff]  ;;  %v43_v12 = vld [vmem:[#allocation2 + $0x8] sm:$0xff]  ;;  %v44_v13 = vld [vmem:[#allocation2 + $0x10] sm:$0xff]  ;;  %v880_v38 = vmov 1.0   ;;  %vm250_vm5 = vcmask 261120   ;;  %vm411_vm6 = vcmask 523264  }
  0x15   :  { %v912_v2 = vand.u32 127, %v28_v0  ;;  %v914_v3 = vshrl.u32 %v28_v0, 7  ;;  %31 = vperm.xlu0 %818, %v26_v7   ;;  %664 = vmatprep.subr.mxu0 %v91_v8  ;;  %v42_v11 = vld [vmem:[#allocation2] sm:$0xff]  ;;  %v27_v14 = vld [vmem:[%s965_s0 + $0x8] sm:$0xff]  ;;  %v45_v17 = vld [vmem:[#allocation2 + $0x18] sm:$0xff]  ;;  %s881_s0 = smov [#allocation5]  }
  0x16   :  { %665 = vmatpush3.msra.mxu0 %v91_v8  ;;  %v745_v16 = vpack.c.bf16 %v43_v12, %v42_v11  ;;  %v749_v18 = vpack.c.bf16 %v45_v17, %v44_v13  ;;  %v46_v19 = vld [vmem:[#allocation2 + $0x20] sm:$0xff]  ;;  %v47_v20 = vld [vmem:[#allocation2 + $0x28] sm:$0xff]  ;;  %v48_v22 = vld [vmem:[#allocation2 + $0x30] sm:$0xff]  ;;  %s592_s26 = sshll.u32 %s881_s0, 4  ;;  %s593_s26 = int_to_ptr.vmem [resolvable:$true] %s592_s26 }
  0x17   :  { %v60_v4 = vadd.s32 8, %v914_v3  ;;  %v65_v5 = vand.u32 7, %v914_v3  ;;  %v753_v21 = vpack.c.bf16 %v47_v20, %v46_v19  ;;  %v49_v23 = vld [vmem:[#allocation2 + $0x38] sm:$0xff]  ;;  %v50_v25 = vld [vmem:[#allocation2 + $0x40] sm:$0xff]  ;;  %v51_v26 = vld [vmem:[#allocation2 + $0x48] sm:$0xff]  ;;  %s849_s27 = scalar_lea.vmem %s593_s26, 256  ;;  %p854_p9 = scmp.lt.s32.totalorder %s593_s26, %s593_s26 }
  0x18   :  { %746 = vmatprep.subr.bf16.mxu0 %v745_v16  ;;  %v757_v24 = vpack.c.bf16 %v49_v23, %v48_v22  ;;  %v761_v27 = vpack.c.bf16 %v51_v26, %v50_v25  ;;  %v52_v28 = vld [vmem:[#allocation2 + $0x50] sm:$0xff]  ;;  %v53_v29 = vld [vmem:[#allocation2 + $0x58] sm:$0xff]  ;;  %v54_v31 = vld [vmem:[#allocation2 + $0x60] sm:$0xff]  ;;  %p850_p8 = scmp.ne.s32.totalorder %s593_s26, %s849_s27  ;;  %p855_p10 = scmp.lt.s32.totalorder %s849_s27, %s849_s27 }
  0x19   :  { %v72_v6 = vand.u32 7, %v60_v4  ;;  %vm85_vm0 = vcmp.eq.s32.totalorder %v65_v5, %v912_v2  ;;  %34 = vperm.xlu0 %818, %v27_v14   ;;  %v765_v30 = vpack.c.bf16 %v53_v29, %v52_v28  ;;  %v55_v32 = vld [vmem:[#allocation2 + $0x68] sm:$0xff]  ;;  %v56_v34 = vld [vmem:[#allocation2 + $0x70] sm:$0xff]  ;;  %v57_v35 = vld [vmem:[#allocation2 + $0x78] sm:$0xff]  ;;  %v286_v5 = vsub.s32 1, %v914_v3 }
  0x1a   :  { %v606_v10 = vsel %vm85_vm0, 1.0, %v879_v9  ;;  %v769_v33 = vpack.c.bf16 %v55_v32, %v54_v31  ;;  %v773_v36 = vpack.c.bf16 %v57_v35, %v56_v34  ;;  %v290_v54 = vld [vmem:[#allocation2 + $0x90] sm:$0xff]  ;;  %v291_v55 = vld [vmem:[#allocation2 + $0x98] sm:$0xff]  ;;  %v292_v56 = vld [vmem:[#allocation2 + $0xa0] sm:$0xff]  ;;  %p856_p11 = por %p855_p10, %p854_p9 }
  0x1b   :  { %vm86_vm2 = vcmp.eq.s32.totalorder %v72_v6, %v912_v2  ;;  %666 = vmatprep.mubr.msk.f32.mxu0 %vm92_vm1, %v606_v10  ;;  %v777_v57 = vpack.c.bf16 %v291_v55, %v290_v54  ;;  %v293_v58 = vld [vmem:[#allocation2 + $0xa8] sm:$0xff]  ;;  %v399_v17 = vld [vmem:[#allocation2 + $0xc0] sm:$0xff]  ;;  %v401_v19 = vld [vmem:[#allocation2 + $0xd0] sm:$0xff] }
  0x1c   :  { %v607_v15 = vsel %vm86_vm2, 1.0, %v879_v9  ;;  %v781_v59 = vpack.c.bf16 %v293_v58, %v292_v56  ;;  %v249_v4 = vld [vmem:[#allocation2 + $0x88] sm:$0x3]  ;;  %v403_v22 = vld [vmem:[#allocation2 + $0xe0] sm:$0xff]  ;;  %v405_v25 = vld [vmem:[#allocation2 + $0xf0] sm:$0xff]  ;;  %p857_p12 = pnand %p856_p11, %p850_p8 }
  0x1d   :  { %667 = vmatmul.mubr.msk.f32.vlgmr.msra.gmra.mrb[0].mxu0 %vm92_vm1, %v607_v15  ;;  %778 = vmatprep.subr.bf16.mxu1 %v777_v57  ;;  %v287_v9 = vrot.slane %v249_v4, %v286_v5  ;;  %v496_v28 = vld [vmem:[#allocation2 + $0x108] sm:$0xff]  ;;  %v497_v55 = vld [vmem:[#allocation2 + $0x110] sm:$0xff]  ;;  %v498_v56 = vld [vmem:[#allocation2 + $0x118] sm:$0xff] }
  0x1e   :  { %748 = vmatpush3.bf16.msra.mxu0 %v745_v16  ;;  %780 = vmatpush3.bf16.msra.mxu1 %v777_v57  ;;  %v398_v16 = vld [vmem:[#allocation2 + $0xb8] sm:$0xff]  ;;  %v805_v57 = vpack.c.bf16 %v498_v56, %v497_v55 }
  0x1f   :  { %750 = vmatprep.subr.bf16.mxu0 %v749_v18  ;;  %782 = vmatprep.subr.bf16.mxu1 %v781_v59  ;;  %v615_v58 = vld [vmem:[#allocation2 + $0xf8] ss:$0 sm:$0xff] }
  0x22   :  { %752 = vmatpush3.bf16.msra.mxu0 %v749_v18  ;;  %784 = vmatpush3.bf16.msra.mxu1 %v781_v59  ;;  %v785_v18 = vpack.c.bf16 %v399_v17, %v398_v16 }
  0x23   :  { %754 = vmatprep.subr.bf16.mxu0 %v753_v21 }
  0x24   :  { %786 = vmatprep.subr.bf16.mxu1 %v785_v18 }
  0x26   :  { %756 = vmatpush3.bf16.msra.mxu0 %v753_v21  ;;  %v402_v21 = vld [vmem:[#allocation2 + $0xd8] sm:$0xff] }
  0x27   :  { %758 = vmatprep.subr.bf16.mxu0 %v757_v24  ;;  %v793_v23 = vpack.c.bf16 %v403_v22, %v402_v21 }
  0x2a   :  { %760 = vmatpush3.bf16.msra.mxu0 %v757_v24  ;;  %v404_v24 = vld [vmem:[#allocation2 + $0xe8] sm:$0xff] }
  0x2b   :  { %762 = vmatprep.subr.bf16.mxu0 %v761_v27  ;;  %v797_v26 = vpack.c.bf16 %v405_v25, %v404_v24 }
  0x2e   :  { %764 = vmatpush3.bf16.msra.mxu0 %v761_v27  ;;  %v495_v27 = vld [vmem:[#allocation2 + $0x100] sm:$0xff] }
  0x2f   :  { %766 = vmatprep.subr.bf16.mxu0 %v765_v30  ;;  %v801_v29 = vpack.c.bf16 %v496_v28, %v495_v27 }
  0x32   :  { %768 = vmatpush3.bf16.msra.mxu0 %v765_v30  ;;  %v612_v30 = vld [vmem:[#allocation2 + $0xb0] ss:$0 sm:$0xff] }
  0x33   :  { %770 = vmatprep.subr.bf16.mxu0 %v769_v33 }
  0x36   :  { %772 = vmatpush3.bf16.msra.mxu0 %v769_v33 }
  0x37   :  { %774 = vmatprep.subr.bf16.mxu0 %v773_v36 }
  0x3a   :  { %776 = vmatpush3.bf16.msra.mxu0 %v773_v36 }
  0x94   :  { %v32_v37 = vpop.permute.xlu0 %31 }
  0x95   :  { %vm36_vm3 = vcmp.eq.s32.totalorder %v912_v2, %v32_v37 }
  0x96   :  { %701 = vmatprep.mubr.msk.f32.mxu0 %vm36_vm3, %v880_v38 }
  0x98   :  { %v35_v39 = vpop.permute.xlu0 %34 }
  0x99   :  { %vm37_vm4 = vcmp.eq.s32.totalorder %v912_v2, %v35_v39  ;;  %v280_v2 = vsub.s32 0, %v914_v3  ;;  %v400_v3 = vld [vmem:[#allocation2 + $0xc8] sm:$0xff] }
  0x9a   :  { %702 = vmatmul.mubr.msk.f32.vlgmr.msra.gmra.mrb[0].mxu0 %vm37_vm4, %v880_v38  ;;  %v789_v20 = vpack.c.bf16 %v401_v19, %v400_v3 }
  0x9b   :  { %v281_v6 = vrot.slane %v249_v4, %v280_v2 }
 0x16d   :  { %v930_v40 = vpop.f32.mrb[0].mxu0 }
 0x16e   :  { %v932_v41 = vpop.f32.mrb[1].mxu0  ;;  %v254_v43 = vsel %vm250_vm5, %v930_v40, 0.0 }
 0x16f   :  { %v251_v42 = vsel %vm250_vm5, %v932_v41, 0.0 }
 0x170   :  { %252 = vadd.xlane.f32.xlu1 %v251_v42 }
 0x174   :  { %255 = vadd.xlane.f32.xlu1 %v254_v43 }
 0x1fd   :  { %v253_v44 = vpop.xlane.xlu1 %252 }
 0x1fe   :  { %v258_v45 = vmul.f32 0.03125, %v253_v44 }
 0x200   :  { %v260_v46 = vsub.f32 %v932_v41, %v258_v45 }
 0x201   :  { %v256_v47 = vpop.xlane.xlu1 %255 }
 0x202   :  { %v259_v48 = vmul.f32 0.03125, %v256_v47  ;;  %v262_v49 = vmul.f32 %v260_v46, %v260_v46 }
 0x204   :  { %v261_v50 = vsub.f32 %v930_v40, %v259_v48  ;;  %v264_v51 = vsel %vm250_vm5, %v262_v49, 0.0 }
 0x205   :  { %265 = vadd.xlane.f32.xlu0 %v264_v51 }
 0x206   :  { %v263_v52 = vmul.f32 %v261_v50, %v261_v50 }
 0x208   :  { %v267_v53 = vsel %vm250_vm5, %v263_v52, 0.0 }
 0x209   :  { %268 = vadd.xlane.f32.xlu1 %v267_v53 }
 0x292   :  { %v266_v60 = vpop.xlane.xlu0 %265 }
 0x293   :  { %v270_v61 = vmul.f32 0.03125, %v266_v60 }
 0x295   :  { %v272_v62 = vadd.f32 1e-05, %v270_v61 }
 0x296   :  { %v269_v63 = vpop.xlane.xlu1 %268 }
 0x297   :  { %819 = vrsqrt.f32 %v272_v62  ;;  %v271_v0 = vmul.f32 0.03125, %v269_v63 }
 0x299   :  { %v273_v1 = vadd.f32 1e-05, %v271_v0 }
 0x29b   :  { %821 = vrsqrt.f32 %v273_v1  ;;  %v618_v1 = vld [vmem:[#allocation2 + $0x120] ss:$0 sm:$0xff] }
 0x2a1   :  { %v820_v7 = vpop.eup %819 }
 0x2a2   :  { %v276_v8 = vmul.f32 %v820_v7, %v260_v46 }
 0x2a4   :  { %v282_v10 = vmul.f32 %v281_v6, %v276_v8 }
 0x2a5   :  { %v822_v11 = vpop.eup %821 }
 0x2a6   :  { %v277_v12 = vmul.f32 %v822_v11, %v261_v50  ;;  %v288_v13 = vadd.f32 %v287_v9, %v282_v10 }
 0x2a8   :  { %v283_v14 = vmul.f32 %v281_v6, %v277_v12  ;;  %712 = vmatprep.mubr.msk.f32.mxu1 %vm250_vm5, %v288_v13 }
 0x2aa   :  { %v289_v15 = vadd.f32 %v287_v9, %v283_v14 }
 0x2ac   :  { %713 = vmatmul.mubr.msk.f32.vlgmr.msra.gmra.mrb[0].mxu1 %vm250_vm5, %v289_v15 }
 0x2ad   :  { %788 = vmatpush3.bf16.msra.mxu1 %v785_v18 }
 0x2ae   :  { %790 = vmatprep.subr.bf16.mxu1 %v789_v20 }
 0x2b1   :  { %792 = vmatpush3.bf16.msra.mxu1 %v789_v20 }
 0x2b2   :  { %794 = vmatprep.subr.bf16.mxu1 %v793_v23 }
 0x2b5   :  { %796 = vmatpush3.bf16.msra.mxu1 %v793_v23 }
 0x2b6   :  { %798 = vmatprep.subr.bf16.mxu1 %v797_v26 }
 0x2b9   :  { %800 = vmatpush3.bf16.msra.mxu1 %v797_v26 }
 0x2ba   :  { %802 = vmatprep.subr.bf16.mxu1 %v801_v29 }
 0x37f   :  { %v714_v31 = vpop.f32.mrb[0].mxu1 }
 0x380   :  { %v377_v32 = vadd.f32 %v714_v31, %v612_v30  ;;  %v371_v33 = vpop.f32.mrb[1].mxu1 }
 0x381   :  { %v372_v34 = vadd.f32 %v612_v30, %v371_v33 }
 0x382   :  { %v381_v35 = vmul.f32 %v377_v32, %v377_v32 }
 0x383   :  { %v380_v36 = vmul.f32 %v372_v34, %v372_v34 }
 0x384   :  { %v383_v37 = vmul.f32 %v381_v35, %v377_v32 }
 0x385   :  { %v382_v38 = vmul.f32 %v380_v36, %v372_v34 }
 0x386   :  { %v385_v39 = vmul.f32 0.044715, %v383_v37 }
 0x387   :  { %v384_v42 = vmul.f32 0.044715, %v382_v38 }
 0x388   :  { %v387_v43 = vadd.f32 %v385_v39, %v377_v32 }
 0x389   :  { %v386_v44 = vadd.f32 %v384_v42, %v372_v34 }
 0x38a   :  { %v389_v45 = vmul.f32 0.7978846, %v387_v43 }
 0x38b   :  { %v388_v46 = vmul.f32 0.7978846, %v386_v44 }
 0x38c   :  { %823 = vtanh.f32 %v389_v45 }
 0x38d   :  { %825 = vtanh.f32 %v388_v46 }
 0x396   :  { %v824_v47 = vpop.eup %823 }
 0x397   :  { %v826_v48 = vpop.eup %825  ;;  %v393_v49 = vadd.f32 1.0, %v824_v47 }
 0x398   :  { %v392_v50 = vadd.f32 1.0, %v826_v48 }
 0x399   :  { %v395_v51 = vmul.f32 0.5, %v393_v49 }
 0x39a   :  { %v394_v52 = vmul.f32 0.5, %v392_v50 }
 0x39b   :  { %v397_v54 = vmul.f32 %v395_v51, %v377_v32 }
 0x39c   :  { %v396_v53 = vmul.f32 %v394_v52, %v372_v34 }
 0x39e   :  { %731 = vmatprep.mubr.msk.f32.mxu1 %vm411_vm6, %v396_v53 }
 0x39f   :  { %732 = vmatmul.mubr.msk.f32.vlgmr.msra.gmra.mrb[2].mxu1 %vm411_vm6, %v397_v54 }
 0x3a0   :  { %804 = vmatpush3.bf16.msra.mxu1 %v801_v29 }
 0x3a1   :  { %806 = vmatprep.subr.bf16.mxu1 %v805_v57 }
 0x3a4   :  { %808 = vmatpush3.bf16.msra.mxu1 %v805_v57 }
 0x472   :  { %v733_v59 = vpop.f32.mrb[2].mxu1 }
 0x473   :  { %v490_v60 = vadd.f32 %v733_v59, %v615_v58  ;;  %v484_v61 = vpop.f32.mrb[3].mxu1 }
 0x474   :  { %v485_v62 = vadd.f32 %v615_v58, %v484_v61 }
 0x475   :  { %v494_v63 = vadd.f32 %v930_v40, %v490_v60 }
 0x476   :  { %v493_v0 = vadd.f32 %v485_v62, %v932_v41 }
 0x478   :  { %742 = vmatprep.mubr.msk.f32.mxu1 %vm250_vm5, %v493_v0 }
 0x479   :  { %743 = vmatmul.mubr.msk.f32.vlgmr.msra.gmra.mrb[4].mxu1 %vm250_vm5, %v494_v63 }
 0x54c   :  { %v744_v2 = vpop.f32.mrb[4].mxu1 }
 0x54d   :  { %v582_v4 = vadd.f32 %v744_v2, %v618_v1  ;;  %v576_v5 = vpop.f32.mrb[5].mxu1 }
 0x54e   :  { %v577_v6 = vadd.f32 %v618_v1, %v576_v5 }
 0x54f   :  { %586 = vst [vmem:[#allocation5 + $0x8] sm:$0xff] %v582_v4 }
 0x550   :  { %585 = vst [vmem:[#allocation5] sm:$0xff] %v577_v6 }
 0x551   :  { %860 = shalt.err (!%p857_p12)
}
 0x552   :  { %s861_s30 = scalar_lea.hbm %s967_s2, 256 }
 0x553   :  { %p862_p13 = scmp.ne.s32.totalorder %s967_s2, %s861_s30  ;;  %p865_p0 = scmp.lt.u32.totalorder %s861_s30, %s967_s2 }
 0x555   :  { %p867_p1 = pnand %p865_p0, %p862_p13 }
 0x557   :  { %870 = shalt.err (!%p867_p1)
}
 0x558   :  { %598 = dma.vmem_to_hbm [thread:$0]  %s593_s26, 256, %s967_s2, [#allocation4], %s876_s19, %s876_s19, %s877_s20  }
 0x559   :  { %873 = dma.done.wait [#allocation4], 256  }
 0x55a   :  { %874 = vsyncadd [#allocation4], 4294967040 }
 0x55b   :  { %602 = vsyncpa [#allocation3], 1 }
 0x55c   :  { %603 = vsyncpa [#allocation4], 1 }

</bundles_post_ra>
